<compile_context>
chip_gen: v5e
topology: v5e:2x2
jax: 0.10.0
libtpu: 0.0.40
codegen_flags: <defaults>
</compile_context>

<pallas_src>
import numpy as np
import jax
import jax.numpy as jnp
from jax.experimental import pallas as pl
from jax.experimental.pallas import tpu as pltpu


def _shift_weight(inp_channels: int) -> np.ndarray:
    """Exact replica of ShiftConv2d1.__init__ weight construction
    (including the dim-1 slicing quirk of the original PyTorch code)."""
    n_div = 5
    g = inp_channels // n_div
    w = np.zeros((inp_channels, 1, 3, 3), dtype=np.float32)
    w[:, 0 * g:1 * g, 0, 1] = 1.0
    w[:, 1 * g:2 * g, 1, 2] = 1.0
    w[:, 2 * g:3 * g, 1, 1] = 1.0
    w[:, 3 * g:4 * g, 2, 1] = 1.0
    w[:, 4 * g:, 1, 1] = 1.0
    return w


def _shift_mode(inp_channels: int) -> bool:
    """Classify the (constant, non-trainable) depthwise stencil at trace time.

    Returns True  -> every channel has the single tap (0, 1): shift the image
                     down by one row (zero-fill the first row).
            False -> every channel has the single tap (1, 1): identity.
    These are the only two patterns the PyTorch constructor can produce.
    """
    w = _shift_weight(inp_channels)[:, 0]                 # (C, 3, 3)
    down = np.zeros((3, 3), np.float32)
    down[0, 1] = 1.0
    ident = np.zeros((3, 3), np.float32)
    ident[1, 1] = 1.0
    if np.array_equal(w, np.broadcast_to(down, w.shape)):
        return True
    if np.array_equal(w, np.broadcast_to(ident, w.shape)):
        return False
    raise NotImplementedError("unexpected ShiftConv2d1 weight pattern")


def _make_lfe1_kernel(H, W, C_in, C_mid, C_out, shift0_down, shift1_down):
    HW = H * W

    def row_shift(t, do_shift):
        # Specialized depthwise "shift" conv: y[h, w, :] = t[h-1, w, :], top
        # row zero.  In the flat (H*W, C) layout this is a shift by W rows —
        # a sublane-axis concat (W = 16 is a multiple of 8, so pure slab moves).
        if not do_shift:
            return t
        zeros = jnp.zeros((W, t.shape[1]), jnp.float32)
        return jnp.concatenate([zeros, t[:HW - W, :]], axis=0)

    def kernel(x_ref, w0_ref, b0_ref, w1t_ref, b1_ref, out_ref):
        x = x_ref[0]                                              # (HW, C_in)

        # conv0: the 1x1 matmul commutes with the spatial shift, so matmul
        # first (MXU), then shift, then bias (+ fused ReLU).  Bias is added
        # after the shift, exactly like the reference module.
        t0 = jnp.dot(x, w0_ref[...],
                     preferred_element_type=jnp.float32)          # (HW, C_mid)
        v = jnp.maximum(row_shift(t0, shift0_down) + b0_ref[...], 0.0)

        # conv1: shift, then 1x1 computed transposed (contract the C_mid dims)
        # so the result is (C_out, HW) -> lane-dense stores (HW = 256 lanes).
        u1 = row_shift(v, shift1_down)                            # (HW, C_mid)
        out_t = jax.lax.dot_general(
            w1t_ref[...], u1, (((1,), (1,)), ((), ())),
            preferred_element_type=jnp.float32)                   # (C_out, HW)
        out_ref[0] = out_t + b1_ref[...]                          # + per-channel bias

    return kernel


def lfe1_forward_pallas(x_nchw, params):
    """LFE1.forward: conv0 (ShiftConv2d1) -> ReLU -> conv1 (ShiftConv2d1)."""
    (w0, b0, w1t, b1), (shift0, shift1) = params
    N, C_in, H, W = x_nchw.shape
    C_mid = w0.shape[1]
    C_out = w1t.shape[0]
    HW = H * W

    # NCHW -> (N, H*W, C_in): flat channels-last layout for the kernel input.
    x_flat = jnp.transpose(x_nchw, (0, 2, 3, 1)).reshape(N, HW, C_in)

    out_flat = pl.pallas_call(
        _make_lfe1_kernel(H, W, C_in, C_mid, C_out, shift0, shift1),
        out_shape=jax.ShapeDtypeStruct((N, C_out, HW), jnp.float32),
        grid_spec=pltpu.PrefetchScalarGridSpec(
            num_scalar_prefetch=0,
            grid=(N,),
            in_specs=[
                pl.BlockSpec((1, HW, C_in), lambda n: (n, 0, 0)),
                pl.BlockSpec((C_in, C_mid), lambda n: (0, 0)),
                pl.BlockSpec((1, C_mid), lambda n: (0, 0)),
                pl.BlockSpec((C_out, C_mid), lambda n: (0, 0)),
                pl.BlockSpec((C_out, 1), lambda n: (0, 0)),
            ],
            out_specs=pl.BlockSpec((1, C_out, HW), lambda n: (n, 0, 0)),
        ),
        compiler_params=pltpu.CompilerParams(
            dimension_semantics=("parallel",)),
    )(x_flat, w0, b0, w1t, b1)

    # (N, C_out, H*W) -> NCHW is a free reshape (no transpose needed).
    return out_flat.reshape(N, C_out, H, W)


def init_lfe1_params(key, in_channels, out_channels, exp_ratio):
    C_in = in_channels
    C_mid = out_channels * exp_ratio
    C_out = out_channels

    # Depthwise "shift" weights are non-trainable compile-time constants:
    # classify them once and specialize the kernel (no weight DMA at runtime).
    shift0 = _shift_mode(C_in)
    shift1 = _shift_mode(C_mid)

    # 1x1 conv weights / biases: deterministic uniform init (PyTorch-like scale).
    k0, k1, k2, k3 = jax.random.split(key, 4)
    s0 = 1.0 / np.sqrt(C_in)
    w0 = jax.random.uniform(k0, (C_in, C_mid), jnp.float32, -s0, s0)    # (Cin, Cmid)
    b0 = jax.random.uniform(k1, (1, C_mid), jnp.float32, -s0, s0)       # (1, Cmid)
    s1 = 1.0 / np.sqrt(C_mid)
    w1t = jax.random.uniform(k2, (C_out, C_mid), jnp.float32, -s1, s1)  # (Cout, Cmid)
    b1 = jax.random.uniform(k3, (C_out, 1), jnp.float32, -s1, s1)       # (Cout, 1)
    return (w0, b0, w1t, b1), (shift0, shift1)


# ----------------------- pure-JAX reference (for checking) -----------------
def _shift_conv_ref(x_nchw, wpw_cin_cout, bias_cout):
    """Faithful ShiftConv2d1 reference: full grouped 3x3 conv + 1x1 conv."""
    N, C, H, W = x_nchw.shape
    x_nhwc = jnp.transpose(x_nchw, (0, 2, 3, 1))
    wk = jnp.asarray(np.transpose(_shift_weight(C), (2, 3, 1, 0)))  # HWIO (3,3,1,C)
    y = jax.lax.conv_general_dilated(
        x_nhwc, wk, window_strides=(1, 1), padding=((1, 1), (1, 1)),
        dimension_numbers=("NHWC", "HWIO", "NHWC"), feature_group_count=C,
        precision=jax.lax.Precision.HIGHEST)
    out = jnp.einsum("nhwc,cm->nhwm", y, wpw_cin_cout,
                     precision=jax.lax.Precision.HIGHEST) + bias_cout
    return jnp.transpose(out, (0, 3, 1, 2))


def lfe1_forward_ref(x_nchw, params):
    (w0, b0, w1t, b1), _ = params
    y = _shift_conv_ref(x_nchw, w0, b0[0])
    y = jnp.maximum(y, 0.0)
    return _shift_conv_ref(y, w1t.T, b1[:, 0])


if __name__ == "__main__":
    in_channels, out_channels, exp_ratio = 10, 10, 4
    N, H, W = 2, 16, 16

    key = jax.random.PRNGKey(0)
    kx, kp = jax.random.split(key)
    x = jax.random.normal(kx, (N, in_channels, H, W), jnp.float32)
    params = init_lfe1_params(kp, in_channels, out_channels, exp_ratio)

    out = lfe1_forward_pallas(x, params)
    out = jax.block_until_ready(out)
    assert out.shape == (N, out_channels, H, W)

    ref = lfe1_forward_ref(x, params)
    rel_err = float(jnp.max(jnp.abs(out - ref)) /
                    (jnp.max(jnp.abs(ref)) + 1e-12))
    # Tight enough to catch any structural bug (those produce O(1) errors)
    # while tolerating possible bf16-pass MXU rounding of the f32 matmuls.
    assert rel_err < 5e-3, f"mismatch vs reference: rel_err={rel_err}"

    print("KERNEL_OK")
</pallas_src>

<mosaic_0001>
module attributes {stable_mosaic.version = 11 : i64} {
  func.func @kernel(%arg0: i32, %arg1: memref<1x256x10xf32, #tpu.memory_space<vmem>>, %arg2: memref<10x40xf32, #tpu.memory_space<vmem>>, %arg3: memref<1x40xf32, #tpu.memory_space<vmem>>, %arg4: memref<10x40xf32, #tpu.memory_space<vmem>>, %arg5: memref<10x1xf32, #tpu.memory_space<vmem>>, %arg6: memref<1x10x256xf32, #tpu.memory_space<vmem>>) attributes {dimension_semantics = [#tpu.dimension_semantics<parallel>], iteration_bounds = array<i64: 2>, scalar_prefetch = 0 : i64, scratch_operands = 0 : i64, tpu.core_type = #tpu.core_type<tc>, window_params = [{transform_indices = @transform_0, window_bounds = array<i64: 1, 256, 10>}, {pipeline_mode = #tpu.pipeline_mode<synchronous>, transform_indices = @transform_1, window_bounds = array<i64: 10, 40>}, {pipeline_mode = #tpu.pipeline_mode<synchronous>, transform_indices = @transform_2, window_bounds = array<i64: 1, 40>}, {pipeline_mode = #tpu.pipeline_mode<synchronous>, transform_indices = @transform_3, window_bounds = array<i64: 10, 40>}, {pipeline_mode = #tpu.pipeline_mode<synchronous>, transform_indices = @transform_4, window_bounds = array<i64: 10, 1>}, {transform_indices = @transform_5, window_bounds = array<i64: 1, 10, 256>}]} {
    %c0 = arith.constant 0 : index
    %c0_0 = arith.constant 0 : index
    %c0_1 = arith.constant 0 : index
    %0 = vector.load %arg1[%c0, %c0_0, %c0_1] : memref<1x256x10xf32, #tpu.memory_space<vmem>>, vector<1x256x10xf32>
    %1 = vector.shape_cast %0 : vector<1x256x10xf32> to vector<256x10xf32>
    %c0_2 = arith.constant 0 : index
    %c0_3 = arith.constant 0 : index
    %2 = vector.load %arg2[%c0_2, %c0_3] : memref<10x40xf32, #tpu.memory_space<vmem>>, vector<10x40xf32>
    %cst = arith.constant dense<0.000000e+00> : vector<256x40xf32>
    %3 = tpu.matmul %1, %2, %cst {dimension_numbers = #tpu.dot_dimension_numbers<[1], [0], [0], [1], [0, 0, 1, 1], [], []>} : vector<256x10xf32>, vector<10x40xf32>, vector<256x40xf32> -> vector<256x40xf32>
    %cst_4 = arith.constant 0.000000e+00 : f32
    %4 = vector.broadcast %cst_4 : f32 to vector<16x40xf32>
    %5 = vector.extract_strided_slice %3 {offsets = [0, 0], sizes = [240, 40], strides = [1, 1]} : vector<256x40xf32> to vector<240x40xf32>
    %6 = tpu.concatenate %4, %5 in 0 : vector<16x40xf32>, vector<240x40xf32> -> vector<256x40xf32>
    %c0_5 = arith.constant 0 : index
    %c0_6 = arith.constant 0 : index
    %7 = vector.load %arg3[%c0_5, %c0_6] : memref<1x40xf32, #tpu.memory_space<vmem>>, vector<1x40xf32>
    %8 = vector.broadcast %7 : vector<1x40xf32> to vector<256x40xf32>
    %9 = arith.addf %6, %8 : vector<256x40xf32>
    %cst_7 = arith.constant 0.000000e+00 : f32
    %10 = vector.broadcast %cst_7 : f32 to vector<256x40xf32>
    %11 = arith.maximumf %9, %10 : vector<256x40xf32>
    %cst_8 = arith.constant 0.000000e+00 : f32
    %12 = vector.broadcast %cst_8 : f32 to vector<16x40xf32>
    %13 = vector.extract_strided_slice %11 {offsets = [0, 0], sizes = [240, 40], strides = [1, 1]} : vector<256x40xf32> to vector<240x40xf32>
    %14 = tpu.concatenate %12, %13 in 0 : vector<16x40xf32>, vector<240x40xf32> -> vector<256x40xf32>
    %c0_9 = arith.constant 0 : index
    %c0_10 = arith.constant 0 : index
    %15 = vector.load %arg4[%c0_9, %c0_10] : memref<10x40xf32, #tpu.memory_space<vmem>>, vector<10x40xf32>
    %cst_11 = arith.constant dense<0.000000e+00> : vector<10x256xf32>
    %16 = tpu.matmul %15, %14, %cst_11 {dimension_numbers = #tpu.dot_dimension_numbers<[1], [1], [0], [0], [0, 0, 1, 0], [], []>} : vector<10x40xf32>, vector<256x40xf32>, vector<10x256xf32> -> vector<10x256xf32>
    %c0_12 = arith.constant 0 : index
    %c0_13 = arith.constant 0 : index
    %17 = vector.load %arg5[%c0_12, %c0_13] : memref<10x1xf32, #tpu.memory_space<vmem>>, vector<10x1xf32>
    %18 = vector.broadcast %17 : vector<10x1xf32> to vector<10x256xf32>
    %19 = arith.addf %16, %18 : vector<10x256xf32>
    %c0_14 = arith.constant 0 : index
    %c0_15 = arith.constant 0 : index
    %c0_16 = arith.constant 0 : index
    %20 = vector.load %arg6[%c0_14, %c0_15, %c0_16] : memref<1x10x256xf32, #tpu.memory_space<vmem>>, vector<1x10x256xf32>
    %21 = vector.shape_cast %20 : vector<1x10x256xf32> to vector<10x256xf32>
    %22 = vector.shape_cast %19 : vector<10x256xf32> to vector<1x10x256xf32>
    tpu.vector_store %arg6[%c0_14, %c0_15, %c0_16], %22 {strides = array<i32>} : memref<1x10x256xf32, #tpu.memory_space<vmem>>, vector<1x10x256xf32>,
    return
  }
  func.func @transform_0(%arg0: i32) -> (i32, i32, i32) {
    %c0_i32 = arith.constant 0 : i32
    %c0_i32_0 = arith.constant 0 : i32
    %c0_i32_1 = arith.constant 0 : i32
    return %arg0, %c0_i32, %c0_i32_0 : i32, i32, i32
  }
  func.func @transform_1(%arg0: i32) -> (i32, i32) {
    %c0_i32 = arith.constant 0 : i32
    %c0_i32_0 = arith.constant 0 : i32
    %c0_i32_1 = arith.constant 0 : i32
    return %c0_i32, %c0_i32_0 : i32, i32
  }
  func.func @transform_2(%arg0: i32) -> (i32, i32) {
    %c0_i32 = arith.constant 0 : i32
    %c0_i32_0 = arith.constant 0 : i32
    %c0_i32_1 = arith.constant 0 : i32
    return %c0_i32, %c0_i32_0 : i32, i32
  }
  func.func @transform_3(%arg0: i32) -> (i32, i32) {
    %c0_i32 = arith.constant 0 : i32
    %c0_i32_0 = arith.constant 0 : i32
    %c0_i32_1 = arith.constant 0 : i32
    return %c0_i32, %c0_i32_0 : i32, i32
  }
  func.func @transform_4(%arg0: i32) -> (i32, i32) {
    %c0_i32 = arith.constant 0 : i32
    %c0_i32_0 = arith.constant 0 : i32
    %c0_i32_1 = arith.constant 0 : i32
    return %c0_i32, %c0_i32_0 : i32, i32
  }
  func.func @transform_5(%arg0: i32) -> (i32, i32, i32) {
    %c0_i32 = arith.constant 0 : i32
    %c0_i32_0 = arith.constant 0 : i32
    %c0_i32_1 = arith.constant 0 : i32
    return %arg0, %c0_i32, %c0_i32_0 : i32, i32, i32
  }
}

</mosaic_0001>

<bundles_post_ra>
// kernel: tpu_custom_call.1
= control target key start
LH: loop header
LB: loop body
LE: loop exit
PB: predicated region body
PF: predicated region fallthrough
CT: control target
= control target key end

     0   :  { %s883_s18 = smov 0   ;;  %s1086_s0 = inlined_call_operand.vmem [shape: f32[2,256,10], index: 0, kind: input, shape index: {}]   ;;  %s1087_s1 = inlined_call_operand.vmem [shape: f32[10,40], index: 1, kind: input, shape index: {}]   ;;  %s1088_s2 = inlined_call_operand.vmem [shape: f32[1,40], index: 2, kind: input, shape index: {}]   ;;  %s1089_s3 = inlined_call_operand.vmem [shape: f32[10,40], index: 3, kind: input, shape index: {}]   ;;  %s1090_s4 = inlined_call_operand.vmem [shape: f32[10,1], index: 4, kind: input, shape index: {}]   ;;  %s1091_s5 = inlined_call_operand.vmem [shape: f32[2,10,256], index: 5, kind: output, shape index: {}]  }
   0x1 LB: > { %s747_s19 = sadd.s32 4294967295, %s849_s18   ;;  %p751_p0 = scmp.ge.s32.totalorder %s849_s18, 1  ;;  %s849_s18 = sphi %s883_s18, %s15_s18  }
   0x2   : > { %p187_p1 = scmp.lt.s32.totalorder %s849_s18, 3 }
   0x4   : > { %p188_p2 = pnand %p751_p0, %p187_p1 }
   0x5   : > { %p215_p3 = scmp.lt.s32.totalorder (!%p188_p2), %s747_s19, 1 }
   0x6   : > { %191 = sbr.rel (%p188_p2) target bundleno = 433 (0x1b1), region = 40 }
   0xb   : > { %v258_v0 = vld [vmem:[%s1087_s1 + $0x8] sm:$0x3]  ;;  %vm356_vm0 = vcmask 1041408   ;;  %v257_v1 = vld [vmem:[%s1087_s1] sm:$0xff]  ;;  %s1093_s19 = smov (!%p215_p3, %s747_s19), 1  ;;  %vm259_vm1 = vcmask 80896  }
   0xc   : > { %756 = vmatpush.msk.msra.mxu0 %vm356_vm0, %v258_v0  ;;  %828 = vmatpush.msk.msra.mxu3 %vm356_vm0, %v258_v0  ;;  %s825_s24 = sshll.u32 %s1093_s19, 8  ;;  %v984_v48 = vld [vmem:[%s1088_s2] ss:$0 sm:$0xff]  ;;  %vm545_vm2 = vcmask 326656   ;;  %s826_s13 = sshll.u32 %s1093_s19, 5 }
   0xd   : > { %827 = vmatpush.msk.msra.mxu1 %vm356_vm0, %v258_v0  ;;  %s903_s27 = scalar_lea.vmem %s1086_s0, %s825_s24  ;;  %s224_s16 = scalar_lea.vmem %s1091_s5, %s826_s13 }
   0xe   : > { %375 = vmatpush.msra.mxu0 %v257_v1  ;;  %830 = vmatpush.msra.mxu3 %v257_v1  ;;  %v225_v2 = vld [vmem:[%s903_s27] sm:$0xff]  ;;  %v246_v3 = vld [vmem:[%s903_s27 + $0xa8] sm:$0xff]  ;;  %v247_v6 = vld [vmem:[%s903_s27 + $0xb0] sm:$0xff] }
   0xf   : > { %829 = vmatpush.msra.mxu1 %v257_v1  ;;  %757 = vmatmul.msk.f32.vlgmr.msra.gmra.mxu0 %vm259_vm1, %v225_v2  ;;  %v238_v4 = vld [vmem:[%s903_s27 + $0x68] sm:$0xff]  ;;  %v239_v7 = vld [vmem:[%s903_s27 + $0x70] sm:$0xff]  ;;  %v248_v9 = vld [vmem:[%s903_s27 + $0xb8] sm:$0xff] }
  0x10   : > { %778 = vmatmul.msk.f32.vlgmr.msra.gmra.mxu3 %vm259_vm1, %v246_v3  ;;  %770 = vmatmul.msk.f32.vlgmr.msra.gmra.mxu1 %vm259_vm1, %v238_v4  ;;  %v226_v5 = vld [vmem:[%s903_s27 + $0x8] sm:$0xff]  ;;  %v227_v8 = vld [vmem:[%s903_s27 + $0x10] sm:$0xff]  ;;  %v240_v10 = vld [vmem:[%s903_s27 + $0x78] sm:$0xff] }
  0x11   : > { %v228_v11 = vld [vmem:[%s903_s27 + $0x18] sm:$0xff]  ;;  %v249_v12 = vld [vmem:[%s903_s27 + $0xc0] sm:$0xff]  ;;  %v250_v15 = vld [vmem:[%s903_s27 + $0xc8] sm:$0xff] }
  0x12   : > { %v241_v13 = vld [vmem:[%s903_s27 + $0x80] sm:$0xff]  ;;  %v242_v16 = vld [vmem:[%s903_s27 + $0x88] sm:$0xff]  ;;  %v251_v18 = vld [vmem:[%s903_s27 + $0xd0] sm:$0xff] }
  0x13   : > { %v229_v14 = vld [vmem:[%s903_s27 + $0x20] sm:$0xff]  ;;  %v230_v17 = vld [vmem:[%s903_s27 + $0x28] sm:$0xff]  ;;  %v243_v19 = vld [vmem:[%s903_s27 + $0x90] sm:$0xff] }
  0x14   : > { %v231_v20 = vld [vmem:[%s903_s27 + $0x30] sm:$0xff]  ;;  %v252_v21 = vld [vmem:[%s903_s27 + $0xd8] sm:$0xff]  ;;  %v245_v24 = vld [vmem:[%s903_s27 + $0xa0] sm:$0xff] }
  0x15   : > { %v244_v22 = vld [vmem:[%s903_s27 + $0x98] sm:$0xff]  ;;  %v233_v25 = vld [vmem:[%s903_s27 + $0x40] sm:$0xff]  ;;  %v234_v26 = vld [vmem:[%s903_s27 + $0x48] sm:$0xff] }
  0x16   : > { %v232_v23 = vld [vmem:[%s903_s27 + $0x38] sm:$0xff]  ;;  %v235_v27 = vld [vmem:[%s903_s27 + $0x50] sm:$0xff]  ;;  %v237_v29 = vld [vmem:[%s903_s27 + $0x60] sm:$0xff] }
  0x17   : > { %758 = vmatmul.msk.f32.gmra.mxu0 %vm259_vm1, %v226_v5  ;;  %v236_v28 = vld [vmem:[%s903_s27 + $0x58] sm:$0xff] }
  0x18   : > { %779 = vmatmul.msk.f32.gmra.mxu3 %vm259_vm1, %v247_v6  ;;  %771 = vmatmul.msk.f32.gmra.mxu1 %vm259_vm1, %v239_v7 }
  0x1f   : > { %759 = vmatmul.msk.f32.gmra.mxu0 %vm259_vm1, %v227_v8 }
  0x20   : > { %780 = vmatmul.msk.f32.gmra.mxu3 %vm259_vm1, %v248_v9  ;;  %772 = vmatmul.msk.f32.gmra.mxu1 %vm259_vm1, %v240_v10 }
  0x27   : > { %760 = vmatmul.msk.f32.gmra.mxu0 %vm259_vm1, %v228_v11 }
  0x28   : > { %781 = vmatmul.msk.f32.gmra.mxu3 %vm259_vm1, %v249_v12  ;;  %773 = vmatmul.msk.f32.gmra.mxu1 %vm259_vm1, %v241_v13 }
  0x2f   : > { %761 = vmatmul.msk.f32.gmra.mxu0 %vm259_vm1, %v229_v14 }
  0x30   : > { %782 = vmatmul.msk.f32.gmra.mxu3 %vm259_vm1, %v250_v15  ;;  %774 = vmatmul.msk.f32.gmra.mxu1 %vm259_vm1, %v242_v16 }
  0x37   : > { %762 = vmatmul.msk.f32.gmra.mxu0 %vm259_vm1, %v230_v17 }
  0x38   : > { %783 = vmatmul.msk.f32.gmra.mxu3 %vm259_vm1, %v251_v18  ;;  %775 = vmatmul.msk.f32.gmra.mxu1 %vm259_vm1, %v243_v19 }
  0x3f   : > { %763 = vmatmul.msk.f32.gmra.mxu0 %vm259_vm1, %v231_v20 }
  0x40   : > { %784 = vmatmul.msk.f32.gmra.mxu3 %vm259_vm1, %v252_v21  ;;  %776 = vmatmul.msk.f32.gmra.mxu1 %vm259_vm1, %v244_v22 }
  0x47   : > { %764 = vmatmul.msk.f32.gmra.mxu0 %vm259_vm1, %v232_v23 }
  0x48   : > { %777 = vmatmul.msk.f32.gmra.mxu1 %vm259_vm1, %v245_v24 }
  0x4f   : > { %765 = vmatmul.msk.f32.gmra.mxu0 %vm259_vm1, %v233_v25 }
  0x57   : > { %766 = vmatmul.msk.f32.gmra.mxu0 %vm259_vm1, %v234_v26 }
  0x5f   : > { %767 = vmatmul.msk.f32.gmra.mxu0 %vm259_vm1, %v235_v27 }
  0x67   : > { %768 = vmatmul.msk.f32.gmra.mxu0 %vm259_vm1, %v236_v28  ;;  %v253_v28 = vld [vmem:[%s903_s27 + $0xe0] sm:$0xff] }
  0x68   : > { %785 = vmatmul.msk.f32.gmra.mxu3 %vm259_vm1, %v253_v28 }
  0x6f   : > { %769 = vmatmul.msk.f32.gmra.mxu0 %vm259_vm1, %v237_v29 }
  0x8c   : > { %v961_v30 = vpop.f32.mrf.mxu0 }
  0x8d   : > { %v963_v32 = vpop.f32.mrf.mxu1 }
  0x93   : > { %v440_v31 = vpop.f32.mrf.mxu3 }
  0x94   : > { %v965_v33 = vpop.f32.mrf.mxu0  ;;  %v495_v3 = vadd.f32 %v984_v48, %v440_v31 }
  0x95   : > { %v969_v36 = vpop.f32.mrf.mxu1 }
  0x96   : > { %v524_v7 = vmax.f32 %v495_v3, 0.0  ;;  %v488_v29 = vadd.f32 %v984_v48, %v969_v36 }
  0x9b   : > { %v443_v34 = vpop.f32.mrf.mxu3 }
  0x9c   : > { %v967_v35 = vpop.f32.mrf.mxu0  ;;  %v496_v0 = vadd.f32 %v984_v48, %v443_v34 }
  0x9d   : > { %v973_v39 = vpop.f32.mrf.mxu1 }
  0x9e   : > { %v525_v4 = vmax.f32 %v496_v0, 0.0  ;;  %v489_v24 = vadd.f32 %v984_v48, %v973_v39 }
  0xa0   : > { %v518_v31 = vmax.f32 %v489_v24, 0.0 }
  0xa3   : > { %v446_v37 = vpop.f32.mrf.mxu3 }
  0xa4   : > { %v971_v38 = vpop.f32.mrf.mxu0  ;;  %v497_v61 = vadd.f32 %v984_v48, %v446_v37 }
  0xa5   : > { %v425_v42 = vpop.f32.mrf.mxu1 }
  0xa6   : > { %v526_v1 = vmax.f32 %v497_v61, 0.0  ;;  %v490_v20 = vadd.f32 %v984_v48, %v425_v42  ;;  %v517_v42 = vmax.f32 %v488_v29, 0.0  ;;  %v534_v61 = vld [vmem:[%s1090_s4 + $0x8] sm:$0x3] }
  0xa8   : > { %v519_v25 = vmax.f32 %v490_v20, 0.0 }
  0xab   : > { %v449_v40 = vpop.f32.mrf.mxu3 }
  0xac   : > { %v975_v41 = vpop.f32.mrf.mxu0  ;;  %v498_v59 = vadd.f32 %v984_v48, %v449_v40  ;;  %v487_v40 = vadd.f32 %v984_v48, %v963_v32 }
  0xad   : > { %v428_v46 = vpop.f32.mrf.mxu1  ;;  %v478_v32 = vadd.f32 %v984_v48, %v975_v41  ;;  %v476_v41 = vadd.f32 %v984_v48, %v967_v35  ;;  %v474_v35 = vadd.f32 %v984_v48, %v961_v30 }
  0xae   : > { %v527_v62 = vmax.f32 %v498_v59, 0.0  ;;  %v491_v17 = vadd.f32 %v984_v48, %v428_v46  ;;  %v254_v46 = vld [vmem:[%s903_s27 + $0xe8] sm:$0xff] }
  0xaf   : > { %786 = vmatmul.msk.f32.gmra.mxu3 %vm259_vm1, %v254_v46  ;;  %v532_v59 = vld [vmem:[%s1089_s3 + $0x8] sm:$0x3] }
  0xb0   : > { %v520_v21 = vmax.f32 %v491_v17, 0.0 }
  0xb3   : > { %v452_v43 = vpop.f32.mrf.mxu3 }
  0xb4   : > { %v977_v44 = vpop.f32.mrf.mxu0  ;;  %v499_v55 = vadd.f32 %v984_v48, %v452_v43 }
  0xb5   : > { %v431_v53 = vpop.f32.mrf.mxu1  ;;  %v479_v36 = vadd.f32 %v984_v48, %v977_v44  ;;  %v477_v44 = vadd.f32 %v984_v48, %v971_v38  ;;  %v533_v38 = vld [vmem:[%s1090_s4] sm:$0xff] }
  0xb6   : > { %v528_v57 = vmax.f32 %v499_v55, 0.0  ;;  %v492_v10 = vadd.f32 %v984_v48, %v431_v53  ;;  %v255_v53 = vld [vmem:[%s903_s27 + $0xf0] sm:$0xff]  ;;  %v851_v55 = vmov 0  }
  0xb7   : > { %787 = vmatmul.msk.f32.gmra.mxu3 %vm259_vm1, %v255_v53  ;;  %841 = vset.pattern.permute.xlu0 %v851_v55 }
  0xb8   : > { %v521_v14 = vmax.f32 %v492_v10, 0.0  ;;  %537 = vperm.xlu0 %841, %v533_v38  }
  0xbb   : > { %v455_v45 = vpop.f32.mrf.mxu3 }
  0xbc   : > { %v979_v47 = vpop.f32.mrf.mxu0  ;;  %v500_v50 = vadd.f32 %v984_v48, %v455_v45 }
  0xbd   : > { %v434_v60 = vpop.f32.mrf.mxu1  ;;  %v480_v34 = vadd.f32 %v984_v48, %v979_v47  ;;  %v516_v47 = vmax.f32 %v487_v40, 0.0 }
  0xbe   : > { %v529_v56 = vmax.f32 %v500_v50, 0.0  ;;  %v493_v8 = vadd.f32 %v984_v48, %v434_v60 }
  0xbf   : > { %v509_v43 = vmax.f32 %v480_v34, 0.0 }
  0xc0   : > { %v522_v11 = vmax.f32 %v493_v8, 0.0  ;;  %542 = vperm.xlu0 %841, %v534_v61  }
  0xc3   : > { %v458_v49 = vpop.f32.mrf.mxu3 }
  0xc4   : > { %v501_v51 = vadd.f32 %v984_v48, %v458_v49  ;;  %v398_v52 = vpop.f32.mrf.mxu0  ;;  %v508_v49 = vmax.f32 %v479_v36, 0.0 }
  0xc5   : > { %v437_v2 = vpop.f32.mrf.mxu1  ;;  %v481_v26 = vadd.f32 %v984_v48, %v398_v52  ;;  %v531_v52 = vld [vmem:[%s1089_s3] sm:$0xff] }
  0xc6   : > { %v530_v54 = vmax.f32 %v501_v51, 0.0  ;;  %v494_v5 = vadd.f32 %v984_v48, %v437_v2  ;;  %v507_v51 = vmax.f32 %v478_v32, 0.0 }
  0xc7   : > { %v510_v37 = vmax.f32 %v481_v26, 0.0 }
  0xc8   : > { %805 = vmatpush.xpose.msk.msra.mxu2 %vm545_vm2, %v530_v54  ;;  %v523_v9 = vmax.f32 %v494_v5, 0.0  ;;  %v506_v54 = vmax.f32 %v477_v44, 0.0 }
  0xcc   : > { %806 = vmatpush.xpose.msk.msra.mxu2 %vm545_vm2, %v529_v56  ;;  %v401_v58 = vpop.f32.mrf.mxu0  ;;  %v256_v56 = vld [vmem:[%s903_s27 + $0xf8] sm:$0xff] }
  0xcd   : > { %v482_v22 = vadd.f32 %v984_v48, %v401_v58  ;;  %v505_v58 = vmax.f32 %v476_v41, 0.0  ;;  %788 = vmatmul.msk.f32.gmra.mxu3 %vm259_vm1, %v256_v56 }
  0xcf   : > { %v511_v27 = vmax.f32 %v482_v22, 0.0 }
  0xd0   : > { %807 = vmatpush.xpose.msk.msra.mxu2 %vm545_vm2, %v528_v57  ;;  %v475_v57 = vadd.f32 %v984_v48, %v965_v33  ;;  %v503_v33 = vmax.f32 %v474_v35, 0.0 }
  0xd2   : > { %v504_v60 = vmax.f32 %v475_v57, 0.0 }
  0xd4   : > { %808 = vmatpush.xpose.msk.msra.mxu2 %vm545_vm2, %v527_v62  ;;  %v404_v63 = vpop.f32.mrf.mxu0  ;;  %v502_v62 = vmax.f32 %v984_v48, 0.0 }
  0xd5   : > { %v483_v18 = vadd.f32 %v984_v48, %v404_v63  ;;  %v852_v63 = vmov 0.0  }
  0xd7   : > { %v512_v23 = vmax.f32 %v483_v18, 0.0 }
  0xd8   : > { %809 = vmatpush.xpose.msk.msra.mxu2 %vm545_vm2, %v526_v1 }
  0xdc   : > { %810 = vmatpush.xpose.msk.msra.mxu2 %vm545_vm2, %v525_v4  ;;  %v407_v6 = vpop.f32.mrf.mxu0 }
  0xdd   : > { %v484_v15 = vadd.f32 %v984_v48, %v407_v6 }
  0xdf   : > { %v513_v19 = vmax.f32 %v484_v15, 0.0 }
  0xe0   : > { %811 = vmatpush.xpose.msk.msra.mxu2 %vm545_vm2, %v524_v7 }
  0xe4   : > { %812 = vmatpush.xpose.msk.msra.mxu2 %vm545_vm2, %v523_v9  ;;  %v410_v12 = vpop.f32.mrf.mxu0 }
  0xe5   : > { %v485_v13 = vadd.f32 %v984_v48, %v410_v12 }
  0xe7   : > { %v514_v16 = vmax.f32 %v485_v13, 0.0 }
  0xe8   : > { %813 = vmatpush.xpose.msk.msra.mxu2 %vm545_vm2, %v522_v11 }
  0xe9   : > { %789 = vmatpush.xpose.msk.msrb.mxu1 %vm545_vm2, %v514_v16 }
  0xeb   : > { %v461_v30 = vpop.f32.mrf.mxu3 }
  0xec   : > { %814 = vmatpush.xpose.msk.msra.mxu2 %vm545_vm2, %v521_v14  ;;  %v413_v39 = vpop.f32.mrf.mxu0 }
  0xed   : > { %790 = vmatpush.xpose.msk.msrb.mxu1 %vm545_vm2, %v513_v19  ;;  %v486_v45 = vadd.f32 %v984_v48, %v413_v39 }
  0xef   : > { %v515_v50 = vmax.f32 %v486_v45, 0.0 }
  0xf0   : > { %815 = vmatpush.xpose.msk.msra.mxu2 %vm545_vm2, %v520_v21 }
  0xf1   : > { %791 = vmatpush.xpose.msk.msrb.mxu1 %vm545_vm2, %v512_v23 }
  0xf4   : > { %816 = vmatpush.xpose.msk.msra.mxu2 %vm545_vm2, %v519_v25 }
  0xf5   : > { %792 = vmatpush.xpose.msk.msrb.mxu1 %vm545_vm2, %v511_v27 }
  0xf8   : > { %817 = vmatpush.xpose.msk.msra.mxu2 %vm545_vm2, %v518_v31 }
  0xf9   : > { %793 = vmatpush.xpose.msk.msrb.mxu1 %vm545_vm2, %v510_v37 }
  0xfc   : > { %818 = vmatpush.xpose.msk.msra.mxu2 %vm545_vm2, %v517_v42 }
  0xfd   : > { %794 = vmatpush.xpose.msk.msrb.mxu1 %vm545_vm2, %v509_v43 }
 0x100   : > { %819 = vmatpush.xpose.msk.msra.mxu2 %vm545_vm2, %v516_v47 }
 0x101   : > { %795 = vmatpush.xpose.msk.msrb.mxu1 %vm545_vm2, %v508_v49 }
 0x104   : > { %820 = vmatpush.xpose.msk.msra.mxu2 %vm545_vm2, %v515_v50 }
 0x105   : > { %796 = vmatpush.xpose.msk.msrb.mxu1 %vm545_vm2, %v507_v51 }
 0x107   : > { %821 = vmatmul.msk.f32.vlgmr.msra.gmra.mxu2 %vm545_vm2, %v531_v52 }
 0x109   : > { %797 = vmatpush.xpose.msk.msrb.mxu1 %vm545_vm2, %v506_v54 }
 0x10d   : > { %798 = vmatpush.xpose.msk.msrb.mxu1 %vm545_vm2, %v505_v58 }
 0x10f   : > { %822 = vmatmul.msk.f32.gmra.mxu2 %vm545_vm2, %v532_v59 }
 0x111   : > { %799 = vmatpush.xpose.msk.msrb.mxu1 %vm545_vm2, %v504_v60 }
 0x115   : > { %800 = vmatpush.xpose.msk.msrb.mxu1 %vm545_vm2, %v503_v33 }
 0x119   : > { %801 = vmatpush.xpose.msk.msrb.mxu1 %vm545_vm2, %v502_v62 }
 0x11d   : > { %802 = vmatpush.xpose.msk.msrb.mxu1 %vm545_vm2, %v502_v62 }
 0x121   : > { %656 = vmatpush.xpose.msrb.mxu1 %v852_v63 }
 0x125   : > { %657 = vmatpush.xpose.msrb.mxu1 %v852_v63 }
 0x128   : > { %803 = vmatmul.msk.f32.vlgmr.msrb.gmra.mxu1 %vm545_vm2, %v531_v52 }
 0x12a   : > { %v538_v1 = vpop.permute.xlu0 %537 }
 0x130   : > { %804 = vmatmul.msk.f32.gmra.mxu1 %vm545_vm2, %v532_v59 }
 0x132   : > { %v463_v0 = vpop.f32.mrf.mxu3  ;;  %v543_v4 = vpop.permute.xlu0 %542 }
 0x13a   : > { %v465_v2 = vpop.f32.mrf.mxu3 }
 0x150   : > { %v467_v5 = vpop.f32.mrf.mxu3 }
 0x18a   : > { %v682_v48 = vpop.f32.mrf.mxu2 }
 0x18b   : > { %v683_v3 = vadd.f32 %v682_v48, %v538_v1 }
 0x18d   : > { %689 = vst [vmem:[%s224_s16 + $0x8] sm:$0xff] %v683_v3 }
 0x192   : > { %v685_v6 = vpop.f32.mrf.mxu2 }
 0x193   : > { %v686_v7 = vadd.f32 %v685_v6, %v543_v4 }
 0x195   : > { %691 = vst [vmem:[%s224_s16 + $0x18] sm:$0x3] %v686_v7 }
 0x1a5   : > { %v659_v8 = vpop.f32.mrf.mxu1 }
 0x1a6   : > { %v660_v9 = vadd.f32 %v659_v8, %v538_v1 }
 0x1a8   : > { %688 = vst [vmem:[%s224_s16] sm:$0xff] %v660_v9 }
 0x1ad   : > { %v662_v10 = vpop.f32.mrf.mxu1 }
 0x1ae   : > { %v663_v11 = vadd.f32 %v662_v10, %v543_v4 }
 0x1b0   : > { %690 = vst [vmem:[%s224_s16 + $0x10] sm:$0x3] %v663_v11 }
 0x1b1 PF: > { %s15_s18 = sadd.s32 1, %s849_s18  }
 0x1b2   : > { %p12_p4 = scmp.ge.s32.totalorder %s15_s18, 4  }
 0x1b4   :  { %14 = sbr.rel (!%p12_p4) target bundleno = 1 (0x1), region = 70 }

</bundles_post_ra>
